<compile_context>
chip_gen: v6e
topology: v6e:2x2x1
jax: 0.10.0
libtpu: 0.0.40
codegen_flags: <defaults>
</compile_context>

<pallas_src>
import jax
import jax.numpy as jnp
from jax.experimental import pallas as pl
from jax.experimental.pallas import tpu as pltpu


# ---------------------------------------------------------------------------
# Kernels
# ---------------------------------------------------------------------------
def _add_one_scalar_kernel(x_ref, o_ref):
    # Scalar path: single element lives in SMEM; pure scalar-unit work.
    o_ref[0, 0] = x_ref[0, 0] + 1


def _add_one_tiled_kernel(x_ref, o_ref):
    # Elementwise hot path on a lane/sublane-dense (TM, C) VMEM tile (VPU).
    o_ref[...] = x_ref[...] + 1


# ---------------------------------------------------------------------------
# Wrappers
# ---------------------------------------------------------------------------
def _round_up(n, m):
    return ((n + m - 1) // m) * m


def _xiayu_scalar(x):
    """0-d input: keep the value in SMEM, skip the VMEM/vreg round-trip."""
    x2d = x.reshape((1, 1))
    out2d = pl.pallas_call(
        _add_one_scalar_kernel,
        out_shape=jax.ShapeDtypeStruct((1, 1), x2d.dtype),
        in_specs=[pl.BlockSpec(memory_space=pltpu.MemorySpace.SMEM)],
        out_specs=pl.BlockSpec(memory_space=pltpu.MemorySpace.SMEM),
    )(x2d)
    return out2d.reshape(())


def _xiayu_tiled(x):
    """General arrays: lane/sublane-dense slab + tiled, pipelined grid."""
    orig_shape = x.shape
    n = x.size
    flat = x.reshape((-1,))

    # Last dim a multiple of 128 lanes, second-to-last a multiple of 8
    # sublanes -> full (8, 128) vregs, unmasked vld/vst.
    lanes = 1024 if n >= 8 * 1024 else 128
    n_pad = _round_up(n, 8 * lanes)
    if n_pad != n:
        flat = jnp.pad(flat, (0, n_pad - n))
    m = n_pad // lanes
    slab = flat.reshape((m, lanes))

    # (512, 1024) f32 block = 2 MiB; in + out, double-buffered = 8 MiB total,
    # well inside the default scoped VMEM limit on v5e / v6e / v7x (64 MiB
    # physical on v7x), while amortizing the ~0.35 us per-step overhead.
    tm = min(m, 512)  # m is a multiple of 8, so tm is too
    grid = (pl.cdiv(m, tm),)

    out = pl.pallas_call(
        _add_one_tiled_kernel,
        out_shape=jax.ShapeDtypeStruct(slab.shape, slab.dtype),
        grid=grid,
        in_specs=[pl.BlockSpec((tm, lanes), lambda i: (i, 0))],
        out_specs=pl.BlockSpec((tm, lanes), lambda i: (i, 0)),
        input_output_aliases={0: 0},  # x+1 is a pure in-place update
        compiler_params=pltpu.CompilerParams(
            dimension_semantics=("parallel",)
        ),
    )(slab)

    return out.reshape((-1,))[:n].reshape(orig_shape)


@jax.jit
def xiayu_forward(x):
    """JAX/Pallas equivalent of Xiayu.forward: returns x + 1 (dtype-preserving)."""
    x = jnp.asarray(x)
    if x.ndim == 0:
        return _xiayu_scalar(x)
    return _xiayu_tiled(x)


if __name__ == "__main__":
    key = jax.random.PRNGKey(0)

    # Primary use case from the module spec: a 0-d scalar (torch.tensor(1.0)).
    x_scalar = jax.random.normal(key, (), dtype=jnp.float32)
    out_scalar = jax.block_until_ready(xiayu_forward(x_scalar))
    expected_scalar = jnp.asarray(x_scalar, jnp.float32) + 1.0
    assert out_scalar.shape == ()
    assert jnp.allclose(out_scalar, expected_scalar, atol=1e-6), (
        out_scalar, expected_scalar)

    # Secondary check: tiled VMEM path on a small 4-D tensor.
    x_arr = jax.random.normal(jax.random.PRNGKey(0), (2, 4, 16, 16),
                              dtype=jnp.float32)
    out_arr = jax.block_until_ready(xiayu_forward(x_arr))
    expected_arr = x_arr + 1.0
    assert out_arr.shape == x_arr.shape
    assert jnp.allclose(out_arr, expected_arr, atol=1e-6)

    print("KERNEL_OK")
</pallas_src>

<mosaic_0001>
module attributes {stable_mosaic.version = 11 : i64} {
  func.func @_add_one_scalar_kernel(%arg0: memref<1x1xf32, #tpu.memory_space<smem>>, %arg1: memref<1x1xf32, #tpu.memory_space<smem>>) attributes {dimension_semantics = [], scalar_prefetch = 0 : i64, scratch_operands = 0 : i64, tpu.core_type = #tpu.core_type<tc>} {
    %c0 = arith.constant 0 : index
    %c0_0 = arith.constant 0 : index
    %0 = memref.load %arg0[%c0, %c0_0] : memref<1x1xf32, #tpu.memory_space<smem>>
    %cst = arith.constant 1.000000e+00 : f32
    %1 = arith.addf %0, %cst : f32
    %c0_1 = arith.constant 0 : index
    %c0_2 = arith.constant 0 : index
    %2 = memref.load %arg1[%c0_1, %c0_2] : memref<1x1xf32, #tpu.memory_space<smem>>
    memref.store %1, %arg1[%c0_1, %c0_2] : memref<1x1xf32, #tpu.memory_space<smem>>
    return
  }
}

</mosaic_0001>

<bundles_post_ra>
// kernel: xiayu_forward.1
= control target key start
LH: loop header
LB: loop body
LE: loop exit
PB: predicated region body
PF: predicated region fallthrough
CT: control target
= control target key end

     0   :  { %7 = vsyncpa [#allocation4], 0  ;;  %s38_s9 = smov [#allocation3]   ;;  %s55_s0 = inlined_call_operand.<no memory space> [shape: f32[1,1], index: 0, kind: input, shape index: {}]   ;;  %s56_s1 = inlined_call_operand.hbm [shape: f32[1,1], index: 1, kind: output, shape index: {}]  }
   0x1   :  { %s11_s8 = sadd.f32 1.0, %s55_s0 }
   0x3   :  { %13 = sst [smem:[#allocation3]] %s11_s8 }
   0x4   :  { %21 = dma.smem_to_hbm %s38_s9, 16, %s56_s1, [#allocation4]  }
   0x5   :  { %36 = dma.done.wait [#allocation4], 16  }
   0x6   :  { %37 = vsyncadd [#allocation4], 4294967280 }
   0x7   :  { %25 = sfence }
   0x8   :  { %26 = vsyncpa [#allocation4], 1 }

</bundles_post_ra>
